<compile_context>
chip_gen: v7x
topology: tpu7x:2x2x1
jax: 0.10.0
libtpu: 0.0.40
codegen_flags: <defaults>
</compile_context>

<pallas_src>
import functools

import jax
import jax.numpy as jnp
from jax import lax
from jax.experimental import pallas as pl
from jax.experimental.pallas import tpu as pltpu


_NUM_CORES = 2               # megacore width on v7x; the extra grid axis is a
                             # harmless sequential loop on single-TC v5e/v6e.
_STATS_TILE_BYTES = 8 << 20  # pass-1 row-tile budget (input only, 2x buffered)
_APPLY_TILE_BYTES = 4 << 20  # pass-2 row-tile budget (input + output, 2x each)
_FUSED_BYTES_F32 = 4 << 20   # whole-array (f32-equivalent) single-pass cutoff


def _round_up(a: int, b: int) -> int:
    return ((a + b - 1) // b) * b


def _row_tile(n: int, d: int, itemsize: int, budget: int,
              override: int | None) -> int:
    """Pick a sublane-aligned row-tile size for an (n, d) operand."""
    dp = _round_up(d, 128)                 # lane-padded VMEM width of a block
    align = max(8, 32 // itemsize)         # native sublanes: 8/16/32 for 4/2/1 B
    if override is not None:
        rows = _round_up(max(int(override), 1), align)
    else:
        rows = max(align, (budget // (dp * itemsize)) // align * align)
    return min(rows, _round_up(n, align))


# --------------------------- fused single-pass ---------------------------- #
def _fused_kernel(x_ref, o_ref, *, mode: str, scale: float):
    """Single-pass PairNorm on a fully VMEM-resident (N, D) matrix."""
    x = x_ref[...].astype(jnp.float32)
    col_mean = jnp.mean(x, axis=0, keepdims=True)                  # (1, D)
    if mode == "PN":
        xc = x - col_mean
        mean_row_sq = jnp.sum(xc * xc) * (1.0 / x.shape[0])
        out = xc * (scale * lax.rsqrt(mean_row_sq + 1e-6))
    elif mode == "PN-SI":
        xc = x - col_mean
        row_sq = jnp.sum(xc * xc, axis=1, keepdims=True)           # (N, 1)
        out = xc * (lax.rsqrt(row_sq + 1e-6) * scale)
    else:  # "PN-SCS"
        row_sq = jnp.sum(x * x, axis=1, keepdims=True)
        out = x * (lax.rsqrt(row_sq + 1e-6) * scale) - col_mean
    o_ref[...] = out.astype(o_ref.dtype)


# ----------------------------- pass 1: stats ------------------------------ #
def _stats_kernel(x_ref, colsum_ref, sqsum_ref=None, *, n_rows: int,
                  tiles_per_core: int, need_sq: bool):
    """Accumulate per-core partial column sums (and squares) of a row tile."""
    @pl.when(pl.program_id(1) == 0)
    def _init():
        colsum_ref[...] = jnp.zeros_like(colsum_ref)
        if need_sq:
            sqsum_ref[...] = jnp.zeros_like(sqsum_ref)

    tn = x_ref.shape[0]
    tile = pl.program_id(0) * tiles_per_core + pl.program_id(1)    # global tile
    row0 = tile * tn
    valid = (lax.broadcasted_iota(jnp.int32, (tn, 1), 0) + row0) < n_rows
    x = jnp.where(valid, x_ref[...].astype(jnp.float32), 0.0)      # ragged mask
    # Per-column accumulation (lane-wise f32) into sublane 0 of this core's
    # (8, D) accumulator block; the remaining sublanes stay zero from init.
    colsum_ref[0:1, :] += jnp.sum(x, axis=0, keepdims=True)
    if need_sq:
        sqsum_ref[0:1, :] += jnp.sum(x * x, axis=0, keepdims=True)


# ----------------------------- pass 2: apply ------------------------------ #
def _apply_kernel(x_ref, colsum_ref, *rest, mode: str, scale: float,
                  inv_n: float, n_rows: float):
    """Apply PairNorm to one (TN, D) row tile; the O(D) epilogue is fused."""
    if mode == "PN":
        sqsum_ref, o_ref = rest
    else:
        (o_ref,) = rest

    x = x_ref[...].astype(jnp.float32)
    col_mean = jnp.sum(colsum_ref[...], axis=0, keepdims=True) * inv_n  # (1, D)

    if mode == "PN":
        sum_sq = jnp.sum(sqsum_ref[...])                                # scalar
        mu_sq = jnp.sum(col_mean * col_mean)
        centered = jnp.maximum(sum_sq - n_rows * mu_sq, 0.0)
        mult = scale * lax.rsqrt(centered * inv_n + 1e-6)
        out = (x - col_mean) * mult
    elif mode == "PN-SI":
        xc = x - col_mean
        row_sq = jnp.sum(xc * xc, axis=1, keepdims=True)                # (TN, 1)
        out = xc * (lax.rsqrt(row_sq + 1e-6) * scale)
    else:  # "PN-SCS"
        row_sq = jnp.sum(x * x, axis=1, keepdims=True)
        out = x * (lax.rsqrt(row_sq + 1e-6) * scale) - col_mean
    o_ref[...] = out.astype(o_ref.dtype)


# -------------------------------- wrapper --------------------------------- #
def pairnorm(x: jax.Array, mode: str = "PN", scale: float = 1.0, *,
             block_rows: int | None = None,
             allow_fused: bool = True) -> jax.Array:
    """PairNorm forward. x: (N, D) node-feature matrix."""
    assert mode in ("None", "PN", "PN-SI", "PN-SCS")
    assert x.ndim == 2
    if mode == "None":
        return x

    N, D = x.shape
    scale = float(scale)
    itemsize = jnp.dtype(x.dtype).itemsize
    need_sq = mode == "PN"
    dp = _round_up(D, 128)
    align = max(8, 32 // itemsize)

    # ---- fused single-pass path: x + out + f32 temps resident in VMEM ----
    fused_f32 = _round_up(N, align) * dp * 4
    if allow_fused and block_rows is None and fused_f32 <= _FUSED_BYTES_F32:
        vlim = max(6 * fused_f32 + (4 << 20), 32 << 20)
        return pl.pallas_call(
            functools.partial(_fused_kernel, mode=mode, scale=scale),
            out_shape=jax.ShapeDtypeStruct((N, D), x.dtype),
            in_specs=[pl.BlockSpec(memory_space=pltpu.MemorySpace.VMEM)],
            out_specs=pl.BlockSpec(memory_space=pltpu.MemorySpace.VMEM),
            compiler_params=pltpu.CompilerParams(vmem_limit_bytes=int(vlim)),
        )(x)

    # ---- pass 1: per-core partial column sums (and squares for 'PN') ----
    tn1 = _row_tile(N, D, itemsize, _STATS_TILE_BYTES, block_rows)
    n_tiles = pl.cdiv(N, tn1)
    tpc = pl.cdiv(n_tiles, _NUM_CORES)     # row tiles per core

    def x1_map(c, i):
        # Clamp so the DMA stays in bounds when _NUM_CORES*tpc > n_tiles; the
        # duplicated tile is fully masked out inside the kernel.
        return (jnp.minimum(c * tpc + i, n_tiles - 1), 0)

    acc_shape = jax.ShapeDtypeStruct((8 * _NUM_CORES, D), jnp.float32)
    acc_spec = pl.BlockSpec((8, D), lambda c, i: (c, 0))
    stats_shapes = (acc_shape, acc_shape) if need_sq else (acc_shape,)
    stats_specs = (acc_spec, acc_spec) if need_sq else (acc_spec,)

    vlim1 = max(2 * tn1 * dp * itemsize + 4 * 8 * _NUM_CORES * dp * 4
                + (4 << 20), 32 << 20)
    stats = pl.pallas_call(
        functools.partial(_stats_kernel, n_rows=N, tiles_per_core=tpc,
                          need_sq=need_sq),
        out_shape=stats_shapes,
        grid=(_NUM_CORES, tpc),
        # If profiling ever shows exposed per-step DMA here (v7x, tiny tiles),
        # pipeline_mode=pl.Buffered(3) on this input spec is the next knob.
        in_specs=[pl.BlockSpec((tn1, D), x1_map)],
        out_specs=stats_specs,
        compiler_params=pltpu.CompilerParams(
            dimension_semantics=("parallel", "arbitrary"),
            vmem_limit_bytes=int(vlim1)),
    )(x)

    # ---- pass 2: apply; the O(D) scalar epilogue is fused into the kernel ----
    tn2 = _row_tile(N, D, itemsize, _APPLY_TILE_BYTES, block_rows)
    in_specs = [pl.BlockSpec((tn2, D), lambda i: (i, 0)),
                pl.BlockSpec((8 * _NUM_CORES, D), lambda i: (0, 0))]
    if need_sq:
        in_specs.append(pl.BlockSpec((8 * _NUM_CORES, D), lambda i: (0, 0)))

    vlim2 = max(4 * tn2 * dp * itemsize
                + (1 + int(need_sq)) * 2 * 8 * _NUM_CORES * dp * 4
                + (4 << 20), 32 << 20)
    return pl.pallas_call(
        functools.partial(_apply_kernel, mode=mode, scale=scale,
                          inv_n=1.0 / N, n_rows=float(N)),
        out_shape=jax.ShapeDtypeStruct((N, D), x.dtype),
        grid=(pl.cdiv(N, tn2),),
        in_specs=in_specs,
        out_specs=pl.BlockSpec((tn2, D), lambda i: (i, 0)),
        compiler_params=pltpu.CompilerParams(
            dimension_semantics=("parallel",),
            vmem_limit_bytes=int(vlim2)),
    )(x, *stats)


# ------------------------------- reference -------------------------------- #
def _pairnorm_ref(x, mode="PN", scale=1.0):
    """Pure-JAX reference mirroring the PyTorch module exactly."""
    if mode == "None":
        return x
    xf = x.astype(jnp.float32)
    col_mean = xf.mean(axis=0)
    if mode == "PN":
        xc = xf - col_mean
        rn = jnp.sqrt(1e-06 + (xc ** 2).sum(axis=1).mean())
        return (scale * xc / rn).astype(x.dtype)
    if mode == "PN-SI":
        xc = xf - col_mean
        rn = jnp.sqrt(1e-06 + (xc ** 2).sum(axis=1, keepdims=True))
        return (scale * xc / rn).astype(x.dtype)
    rn = jnp.sqrt(1e-06 + (xf ** 2).sum(axis=1, keepdims=True))
    return (scale * xf / rn - col_mean).astype(x.dtype)


if __name__ == "__main__":
    key = jax.random.PRNGKey(0)
    ok = True
    # (shape, block_rows, allow_fused):
    #   1) small aligned shape           -> fused single-pass VMEM path
    #   2) ragged rows + narrow features -> tiled path, partial-tile masking
    #   3) non-128 feature dim, tiny N   -> tiled path with default budgets
    configs = [((64, 32), None, True),
               ((60, 48), 16, False),
               ((33, 130), None, False)]
    for idx, ((n, d), br, fused) in enumerate(configs):
        x = jax.random.normal(jax.random.fold_in(key, idx), (n, d),
                              dtype=jnp.float32)
        for mode in ("PN", "PN-SI", "PN-SCS", "None"):
            out = jax.block_until_ready(
                pairnorm(x, mode=mode, scale=1.0, block_rows=br,
                         allow_fused=fused))
            ref = _pairnorm_ref(x, mode=mode, scale=1.0)
            if out.shape != ref.shape or not jnp.allclose(out, ref,
                                                          atol=1e-4, rtol=1e-4):
                ok = False
                print(f"MISMATCH mode={mode} shape={(n, d)} max_err="
                      f"{float(jnp.max(jnp.abs(out - ref)))}")
    if ok:
        print("KERNEL_OK")
</pallas_src>

<mosaic_0001>
module attributes {stable_mosaic.version = 11 : i64} {
  func.func @_fused_kernel(%arg0: memref<64x32xf32, #tpu.memory_space<vmem>>, %arg1: memref<64x32xf32, #tpu.memory_space<vmem>>) attributes {dimension_semantics = [], scalar_prefetch = 0 : i64, scratch_operands = 0 : i64, tpu.core_type = #tpu.core_type<tc>} {
    %c0 = arith.constant 0 : index
    %c0_0 = arith.constant 0 : index
    %0 = vector.load %arg0[%c0, %c0_0] : memref<64x32xf32, #tpu.memory_space<vmem>>, vector<64x32xf32>
    %cst = arith.constant dense<0.000000e+00> : vector<32xf32>
    %1 = vector.multi_reduction <add>, %0, %cst [0] : vector<64x32xf32> to vector<32xf32>
    %2 = vector.shape_cast %1 : vector<32xf32> to vector<1x32xf32>
    %cst_1 = arith.constant 6.400000e+01 : f32
    %3 = vector.broadcast %cst_1 : f32 to vector<1x32xf32>
    %4 = arith.divf %2, %3 : vector<1x32xf32>
    %5 = vector.broadcast %4 : vector<1x32xf32> to vector<64x32xf32>
    %6 = arith.subf %0, %5 : vector<64x32xf32>
    %7 = arith.mulf %6, %6 : vector<64x32xf32>
    %8 = vector.shape_cast %7 : vector<64x32xf32> to vector<1x64x32xf32>
    %cst_2 = arith.constant dense<0.000000e+00> : vector<1xf32>
    %9 = vector.multi_reduction <add>, %8, %cst_2 [1, 2] : vector<1x64x32xf32> to vector<1xf32>
    %10 = vector.shape_cast %9 : vector<1xf32> to vector<1x1x1xf32>
    %11 = vector.extract %10[0, 0, 0] : f32 from vector<1x1x1xf32>
    %cst_3 = arith.constant 1.562500e-02 : f32
    %12 = arith.mulf %11, %cst_3 : f32
    %cst_4 = arith.constant 9.99999997E-7 : f32
    %13 = arith.addf %12, %cst_4 : f32
    %14 = math.rsqrt %13 : f32
    %cst_5 = arith.constant 1.000000e+00 : f32
    %15 = arith.mulf %cst_5, %14 : f32
    %16 = vector.broadcast %15 : f32 to vector<64x32xf32>
    %17 = arith.mulf %6, %16 : vector<64x32xf32>
    %c0_6 = arith.constant 0 : index
    %c0_7 = arith.constant 0 : index
    %18 = vector.load %arg1[%c0_6, %c0_7] : memref<64x32xf32, #tpu.memory_space<vmem>>, vector<64x32xf32>
    tpu.vector_store %arg1[%c0_6, %c0_7], %17 {strides = array<i32>} : memref<64x32xf32, #tpu.memory_space<vmem>>, vector<64x32xf32>,
    return
  }
}

</mosaic_0001>

<bundles_post_ra>
// kernel: tpu_custom_call.1
= control target key start
LH: loop header
LB: loop body
LE: loop exit
PB: predicated region body
PF: predicated region fallthrough
CT: control target
= control target key end

     0   :  { %vm16_vm0 = vcmask 261120   ;;  %s194_s0 = inlined_call_operand.vmem [shape: f32[64,32], index: 0, kind: input, shape index: {}]   ;;  %s195_s1 = inlined_call_operand.vmem [shape: f32[64,32], index: 1, kind: output, shape index: {}]  }
   0x1   :  { %v8_v0 = vld [vmem:[%s194_s0] sm:$0xff]  ;;  %v9_v1 = vld [vmem:[%s194_s0 + $0x8] sm:$0xff]  ;;  %v10_v2 = vld [vmem:[%s194_s0 + $0x10] sm:$0xff] }
   0x2   :  { %v11_v3 = vld [vmem:[%s194_s0 + $0x18] sm:$0xff]  ;;  %v17_v4 = vsel %vm16_vm0, %v8_v0, 0.0  ;;  %v18_v5 = vsel %vm16_vm0, %v9_v1, 0.0  ;;  %v20_v6 = vsel %vm16_vm0, %v10_v2, 0.0  ;;  %v12_v7 = vld [vmem:[%s194_s0 + $0x20] sm:$0xff]  ;;  %v13_v10 = vld [vmem:[%s194_s0 + $0x28] sm:$0xff] }
   0x3   :  { %v19_v8 = vadd.f32 %v18_v5, %v17_v4  ;;  %v22_v9 = vsel %vm16_vm0, %v11_v3, 0.0  ;;  %v24_v12 = vsel %vm16_vm0, %v12_v7, 0.0  ;;  %v14_v13 = vld [vmem:[%s194_s0 + $0x30] sm:$0xff]  ;;  %v26_v15 = vsel %vm16_vm0, %v13_v10, 0.0  ;;  %v15_v16 = vld [vmem:[%s194_s0 + $0x38] sm:$0xff] }
   0x4   :  { %v28_v18 = vsel %vm16_vm0, %v14_v13, 0.0  ;;  %v30_v20 = vsel %vm16_vm0, %v15_v16, 0.0 }
   0x5   :  { %v21_v11 = vadd.f32 %v20_v6, %v19_v8 }
   0x7   :  { %v23_v14 = vadd.f32 %v22_v9, %v21_v11 }
   0x9   :  { %v25_v17 = vadd.f32 %v24_v12, %v23_v14 }
   0xb   :  { %v27_v19 = vadd.f32 %v26_v15, %v25_v17 }
   0xd   :  { %v29_v21 = vadd.f32 %v28_v18, %v27_v19 }
   0xf   :  { %v31_v22 = vadd.f32 %v30_v20, %v29_v21 }
  0x11   :  { %v32_v23 = vrot.slane %v31_v22, 4 }
  0x13   :  { %v33_v24 = vadd.f32 %v32_v23, %v31_v22 }
  0x15   :  { %v34_v25 = vrot.slane %v33_v24, 2 }
  0x17   :  { %v35_v26 = vadd.f32 %v34_v25, %v33_v24 }
  0x19   :  { %v36_v27 = vrot.slane %v35_v26, 1 }
  0x1b   :  { %v37_v28 = vadd.f32 %v36_v27, %v35_v26 }
  0x1d   :  { %v39_v29 = vmul.f32 0.015625, %v37_v28 }
  0x1f   :  { %v40_v30 = vsub.f32 %v8_v0, %v39_v29  ;;  %v41_v31 = vsub.f32 %v9_v1, %v39_v29  ;;  %v42_v32 = vsub.f32 %v10_v2, %v39_v29  ;;  %v43_v33 = vsub.f32 %v11_v3, %v39_v29 }
  0x20   :  { %v44_v34 = vsub.f32 %v12_v7, %v39_v29  ;;  %v45_v35 = vsub.f32 %v13_v10, %v39_v29  ;;  %v46_v40 = vsub.f32 %v14_v13, %v39_v29  ;;  %v47_v46 = vsub.f32 %v15_v16, %v39_v29 }
  0x21   :  { %v48_v36 = vmul.f32 %v40_v30, %v40_v30  ;;  %v49_v37 = vmul.f32 %v41_v31, %v41_v31  ;;  %v50_v38 = vmul.f32 %v42_v32, %v42_v32  ;;  %v51_v39 = vmul.f32 %v43_v33, %v43_v33 }
  0x22   :  { %v52_v41 = vmul.f32 %v44_v34, %v44_v34  ;;  %v53_v47 = vmul.f32 %v45_v35, %v45_v35  ;;  %v54_v50 = vmul.f32 %v46_v40, %v46_v40  ;;  %v55_v53 = vmul.f32 %v47_v46, %v47_v46 }
  0x23   :  { %v56_v42 = vsel %vm16_vm0, %v48_v36, 0.0  ;;  %v57_v43 = vsel %vm16_vm0, %v49_v37, 0.0  ;;  %v59_v44 = vsel %vm16_vm0, %v50_v38, 0.0  ;;  %v61_v48 = vsel %vm16_vm0, %v51_v39, 0.0 }
  0x24   :  { %v58_v45 = vadd.f32 %v57_v43, %v56_v42  ;;  %v63_v51 = vsel %vm16_vm0, %v52_v41, 0.0  ;;  %v65_v54 = vsel %vm16_vm0, %v53_v47, 0.0  ;;  %v67_v56 = vsel %vm16_vm0, %v54_v50, 0.0 }
  0x25   :  { %v69_v58 = vsel %vm16_vm0, %v55_v53, 0.0 }
  0x26   :  { %v60_v49 = vadd.f32 %v59_v44, %v58_v45 }
  0x28   :  { %v62_v52 = vadd.f32 %v61_v48, %v60_v49 }
  0x2a   :  { %v64_v55 = vadd.f32 %v63_v51, %v62_v52 }
  0x2c   :  { %v66_v57 = vadd.f32 %v65_v54, %v64_v55 }
  0x2e   :  { %v68_v59 = vadd.f32 %v67_v56, %v66_v57 }
  0x30   :  { %v70_v60 = vadd.f32 %v69_v58, %v68_v59 }
  0x32   :  { %71 = vadd.xlane.f32.xlu0 %v70_v60 }
  0xbf   :  { %v72_v61 = vpop.xlane.xlu0 %71 }
  0xc0   :  { %v73_v62 = vrot.slane %v72_v61, 4 }
  0xc2   :  { %v74_v63 = vadd.f32 %v73_v62, %v72_v61 }
  0xc4   :  { %v75_v0 = vrot.slane %v74_v63, 2 }
  0xc6   :  { %v76_v1 = vadd.f32 %v75_v0, %v74_v63 }
  0xc8   :  { %v77_v2 = vrot.slane %v76_v1, 1 }
  0xca   :  { %v78_v3 = vadd.f32 %v77_v2, %v76_v1 }
  0xcc   :  { %106 = vpush %v78_v3 }
  0xfd   :  { %s107_s0 = spop %106 }
  0xfe   :  { %s80_s22 = smul.f32 0.015625, %s107_s0 }
 0x100   :  { %s81_s23 = sadd.f32 1e-06, %s80_s22 }
 0x102   :  { %v82_v4 = vstv %s81_s23 }
 0x103   :  { %110 = vrsqrt.f32 %v82_v4 }
 0x10d   :  { %v111_v5 = vpop.eup %110 }
 0x10e   :  { %108 = vpush %v111_v5 }
 0x13f   :  { %s109_s24 = spop %108 }
 0x140   :  { %v85_v6 = vstv %s109_s24 }
 0x141   :  { %v86_v7 = vmul.f32 %v85_v6, %v40_v30  ;;  %v87_v8 = vmul.f32 %v85_v6, %v41_v31  ;;  %v88_v9 = vmul.f32 %v85_v6, %v42_v32  ;;  %v89_v10 = vmul.f32 %v85_v6, %v43_v33 }
 0x142   :  { %v90_v11 = vmul.f32 %v85_v6, %v44_v34  ;;  %v91_v12 = vmul.f32 %v85_v6, %v45_v35  ;;  %v92_v13 = vmul.f32 %v85_v6, %v46_v40  ;;  %v93_v14 = vmul.f32 %v85_v6, %v47_v46 }
 0x143   :  { %94 = vst.msk [vmem:[%s195_s1] sm:$0xff] %vm16_vm0, %v86_v7  ;;  %95 = vst.msk [vmem:[%s195_s1 + $0x8] sm:$0xff] %vm16_vm0, %v87_v8 }
 0x144   :  { %96 = vst.msk [vmem:[%s195_s1 + $0x10] sm:$0xff] %vm16_vm0, %v88_v9  ;;  %97 = vst.msk [vmem:[%s195_s1 + $0x18] sm:$0xff] %vm16_vm0, %v89_v10 }
 0x145   :  { %98 = vst.msk [vmem:[%s195_s1 + $0x20] sm:$0xff] %vm16_vm0, %v90_v11  ;;  %99 = vst.msk [vmem:[%s195_s1 + $0x28] sm:$0xff] %vm16_vm0, %v91_v12 }
 0x146   :  { %100 = vst.msk [vmem:[%s195_s1 + $0x30] sm:$0xff] %vm16_vm0, %v92_v13  ;;  %101 = vst.msk [vmem:[%s195_s1 + $0x38] sm:$0xff] %vm16_vm0, %v93_v14 }

</bundles_post_ra>
